<compile_context>
chip_gen: v7x
topology: tpu7x:2x2x1
jax: 0.10.0
libtpu: 0.0.40
codegen_flags: <defaults>
</compile_context>

<pallas_src>
import jax
import jax.numpy as jnp
from jax.experimental import pallas as pl
from jax.experimental.pallas import tpu as pltpu


def fc_kernel(x_ref, w_ref, b_ref, o_ref):
    # x_ref: (1, B, e_blk*IN)      w_ref: (1, e_blk*IN, e_blk*OUT)
    # b_ref: (1, 1, e_blk*OUT)     o_ref: (1, B, e_blk*OUT)
    y = jnp.dot(x_ref[0], w_ref[0], preferred_element_type=jnp.float32)  # MXU
    o_ref[0] = (y + b_ref[0]).astype(o_ref.dtype)                        # fused bias add


def _vmem_capacity_bytes():
    try:
        return int(pltpu.get_tpu_info().vmem_capacity_bytes)
    except Exception:
        return 64 << 20  # conservative default (v7x per-TC physical VMEM)


def _choose_e_blk(E, B, IN, OUT, itemsize, block_budget):
    """Largest ensemble block whose (x, w_bd, bias, out) block set fits the budget,
    preferring divisors of E whose slab widths are 128-multiples (lane-dense)."""
    def block_bytes(e):
        return itemsize * (B * e * IN             # x slab
                           + (e * IN) * (e * OUT)  # block-diagonal weight
                           + e * OUT               # bias
                           + B * e * OUT)          # output slab
    divisors = [e for e in range(1, E + 1) if E % e == 0]
    lane_dense = [e for e in divisors
                  if (e * OUT) % 128 == 0 and (e * IN) % 128 == 0]
    pool = lane_dense if lane_dense else divisors
    for e in sorted(pool, reverse=True):
        if block_bytes(e) <= block_budget:
            return e
    return min(pool)


def ensemble_fc(x, weight, bias, *, e_blk=None, compute_dtype=None,
                force_pallas=False, interpret=False):
    """x: (E, B, IN), weight: (E, IN, OUT), bias: (E, OUT) -> (E, B, OUT)."""
    E, B, IN = x.shape
    _, _, OUT = weight.shape
    out_dtype = x.dtype

    # Tiny problems: fixed pallas_call / grid-step overhead dominates -> let XLA fuse.
    if not force_pallas and 2 * E * B * IN * OUT < (1 << 21):
        return (jnp.einsum("ebi,eio->ebo", x, weight) + bias[:, None, :]).astype(out_dtype)

    # Generation-aware VMEM sizing: double-buffered blocks + compiler scratch
    # must fit inside the scoped limit.
    vmem = _vmem_capacity_bytes()
    vmem_limit = min(int(vmem * 0.7), 96 << 20)   # ~45 MiB on v7x, 90-96 MiB on v5e/v6e
    block_budget = vmem_limit // 3                # one full (un-double-buffered) block set

    itemsize = jnp.dtype(compute_dtype or x.dtype).itemsize
    if e_blk is None:
        e_blk = _choose_e_blk(E, B, IN, OUT, itemsize, block_budget)
    e_blk = int(min(e_blk, E))

    G = pl.cdiv(E, e_blk)
    E_pad = G * e_blk
    if E_pad != E:                                 # only hit with a user-forced e_blk
        pad = E_pad - E
        x = jnp.pad(x, ((0, pad), (0, 0), (0, 0)))
        weight = jnp.pad(weight, ((0, pad), (0, 0), (0, 0)))
        bias = jnp.pad(bias, ((0, pad), (0, 0)))

    # Lane-dense activation slab: member-major lanes, (G, B, e_blk*IN).
    x_slab = (x.reshape(G, e_blk, B, IN)
                .transpose(0, 2, 1, 3)
                .reshape(G, B, e_blk * IN))

    # Block-diagonal weight (G, e_blk*IN, e_blk*OUT): member e occupies rows
    # [e*IN,(e+1)*IN) and cols [e*OUT,(e+1)*OUT).  Weights are parameters, so in
    # a real model build this once outside the step function and reuse it.
    w_g = weight.reshape(G, e_blk, IN, OUT)
    eye = jnp.eye(e_blk, dtype=weight.dtype)
    w_bd = (jnp.einsum("geio,ef->geifo", w_g, eye)
              .reshape(G, e_blk * IN, e_blk * OUT))

    # Bias in the output-slab layout; epilogue add stays in f32.
    bias_flat = bias.reshape(G, 1, e_blk * OUT).astype(jnp.float32)

    if compute_dtype is not None:                  # e.g. jnp.bfloat16
        x_slab = x_slab.astype(compute_dtype)
        w_bd = w_bd.astype(compute_dtype)

    out_raw = pl.pallas_call(
        fc_kernel,
        out_shape=jax.ShapeDtypeStruct((G, B, e_blk * OUT), out_dtype),
        grid_spec=pltpu.PrefetchScalarGridSpec(
            num_scalar_prefetch=0,
            grid=(G,),
            in_specs=[
                pl.BlockSpec((1, B, e_blk * IN), lambda g: (g, 0, 0)),
                pl.BlockSpec((1, e_blk * IN, e_blk * OUT), lambda g: (g, 0, 0)),
                pl.BlockSpec((1, 1, e_blk * OUT), lambda g: (g, 0, 0)),
            ],
            out_specs=pl.BlockSpec((1, B, e_blk * OUT), lambda g: (g, 0, 0)),
        ),
        compiler_params=pltpu.CompilerParams(
            # TODO(synk): CORE_PARALLEL / pl.core_map on v7x to split E over 2 TCs.
            dimension_semantics=("parallel",),
            vmem_limit_bytes=int(vmem_limit),
        ),
        interpret=interpret,
    )(x_slab, w_bd, bias_flat)

    # Un-shuffle the lane-dense slab back to the native (E, B, OUT) layout.
    # (Separate XLA pass; skip it if the consumer accepts the slab layout.)
    out = (out_raw.reshape(G, B, e_blk, OUT)
                  .transpose(0, 2, 1, 3)
                  .reshape(E_pad, B, OUT))
    return out[:E] if E_pad != E else out


if __name__ == "__main__":
    # Small shapes consistent with an ensemble dynamics model's FC layer.
    # With e_blk=8: lane-dense slabs (e_blk*IN=256, e_blk*OUT=128) and grid G=4.
    E, B, IN, OUT = 32, 16, 32, 16

    key = jax.random.PRNGKey(0)
    k_x, k_w, k_b = jax.random.split(key, 3)
    x = jax.random.normal(k_x, (E, B, IN), dtype=jnp.float32)
    weight = jax.random.normal(k_w, (E, IN, OUT), dtype=jnp.float32) * 0.1
    bias = jax.random.normal(k_b, (E, OUT), dtype=jnp.float32) * 0.1

    ref = (jnp.einsum("ebi,eio->ebo", x, weight,
                      precision=jax.lax.Precision.HIGHEST)
           + bias[:, None, :])

    # Explicit e_blk=8 exercises a multi-step grid (G=4).
    out = ensemble_fc(x, weight, bias, e_blk=8, force_pallas=True)
    jax.block_until_ready(out)
    assert out.shape == (E, B, OUT)
    assert jnp.allclose(out, ref, atol=1e-4, rtol=1e-4)

    # Auto-chosen e_blk (chooser picks the largest lane-dense divisor of E).
    out_auto = ensemble_fc(x, weight, bias, force_pallas=True)
    jax.block_until_ready(out_auto)
    assert jnp.allclose(out_auto, ref, atol=1e-4, rtol=1e-4)

    print("KERNEL_OK")
</pallas_src>

<mosaic_0001>
module attributes {stable_mosaic.version = 11 : i64} {
  func.func @fc_kernel(%arg0: i32, %arg1: memref<1x16x256xf32, #tpu.memory_space<vmem>>, %arg2: memref<1x256x128xf32, #tpu.memory_space<vmem>>, %arg3: memref<1x1x128xf32, #tpu.memory_space<vmem>>, %arg4: memref<1x16x128xf32, #tpu.memory_space<vmem>>) attributes {dimension_semantics = [#tpu.dimension_semantics<parallel>], iteration_bounds = array<i64: 4>, scalar_prefetch = 0 : i64, scratch_operands = 0 : i64, tpu.core_type = #tpu.core_type<tc>, window_params = [{transform_indices = @transform_0, window_bounds = array<i64: 1, 16, 256>}, {transform_indices = @transform_1, window_bounds = array<i64: 1, 256, 128>}, {transform_indices = @transform_2, window_bounds = array<i64: 1, 1, 128>}, {transform_indices = @transform_3, window_bounds = array<i64: 1, 16, 128>}]} {
    %c0 = arith.constant 0 : index
    %c0_0 = arith.constant 0 : index
    %c0_1 = arith.constant 0 : index
    %0 = vector.load %arg1[%c0, %c0_0, %c0_1] : memref<1x16x256xf32, #tpu.memory_space<vmem>>, vector<1x16x256xf32>
    %1 = vector.shape_cast %0 : vector<1x16x256xf32> to vector<16x256xf32>
    %c0_2 = arith.constant 0 : index
    %c0_3 = arith.constant 0 : index
    %c0_4 = arith.constant 0 : index
    %2 = vector.load %arg2[%c0_2, %c0_3, %c0_4] : memref<1x256x128xf32, #tpu.memory_space<vmem>>, vector<1x256x128xf32>
    %3 = vector.shape_cast %2 : vector<1x256x128xf32> to vector<256x128xf32>
    %cst = arith.constant dense<0.000000e+00> : vector<16x128xf32>
    %4 = tpu.matmul %1, %3, %cst {dimension_numbers = #tpu.dot_dimension_numbers<[1], [0], [0], [1], [0, 0, 1, 1], [], []>} : vector<16x256xf32>, vector<256x128xf32>, vector<16x128xf32> -> vector<16x128xf32>
    %c0_5 = arith.constant 0 : index
    %c0_6 = arith.constant 0 : index
    %c0_7 = arith.constant 0 : index
    %5 = vector.load %arg3[%c0_5, %c0_6, %c0_7] : memref<1x1x128xf32, #tpu.memory_space<vmem>>, vector<1x1x128xf32>
    %6 = vector.shape_cast %5 : vector<1x1x128xf32> to vector<1x128xf32>
    %7 = vector.broadcast %6 : vector<1x128xf32> to vector<16x128xf32>
    %8 = arith.addf %4, %7 : vector<16x128xf32>
    %c0_8 = arith.constant 0 : index
    %c0_9 = arith.constant 0 : index
    %c0_10 = arith.constant 0 : index
    %9 = vector.load %arg4[%c0_8, %c0_9, %c0_10] : memref<1x16x128xf32, #tpu.memory_space<vmem>>, vector<1x16x128xf32>
    %10 = vector.shape_cast %9 : vector<1x16x128xf32> to vector<16x128xf32>
    %11 = vector.shape_cast %8 : vector<16x128xf32> to vector<1x16x128xf32>
    tpu.vector_store %arg4[%c0_8, %c0_9, %c0_10], %11 {strides = array<i32>} : memref<1x16x128xf32, #tpu.memory_space<vmem>>, vector<1x16x128xf32>,
    return
  }
  func.func @transform_0(%arg0: i32) -> (i32, i32, i32) {
    %c0_i32 = arith.constant 0 : i32
    %c0_i32_0 = arith.constant 0 : i32
    %c0_i32_1 = arith.constant 0 : i32
    return %arg0, %c0_i32, %c0_i32_0 : i32, i32, i32
  }
  func.func @transform_1(%arg0: i32) -> (i32, i32, i32) {
    %c0_i32 = arith.constant 0 : i32
    %c0_i32_0 = arith.constant 0 : i32
    %c0_i32_1 = arith.constant 0 : i32
    return %arg0, %c0_i32, %c0_i32_0 : i32, i32, i32
  }
  func.func @transform_2(%arg0: i32) -> (i32, i32, i32) {
    %c0_i32 = arith.constant 0 : i32
    %c0_i32_0 = arith.constant 0 : i32
    %c0_i32_1 = arith.constant 0 : i32
    return %arg0, %c0_i32, %c0_i32_0 : i32, i32, i32
  }
  func.func @transform_3(%arg0: i32) -> (i32, i32, i32) {
    %c0_i32 = arith.constant 0 : i32
    %c0_i32_0 = arith.constant 0 : i32
    %c0_i32_1 = arith.constant 0 : i32
    return %arg0, %c0_i32, %c0_i32_0 : i32, i32, i32
  }
}

</mosaic_0001>

<bundles_post_ra>
// kernel: tpu_custom_call.1
= control target key start
LH: loop header
LB: loop body
LE: loop exit
PB: predicated region body
PF: predicated region fallthrough
CT: control target
= control target key end

     0   :  { %8 = vsyncpa [#allocation3], 0  ;;  %s1064_s0 = inlined_call_operand.hbm [shape: f32[4,16,256], index: 0, kind: input, shape index: {}]   ;;  %s1065_s1 = inlined_call_operand.hbm [shape: f32[4,256,128], index: 1, kind: input, shape index: {}]   ;;  %s1066_s2 = inlined_call_operand.vmem [shape: f32[4,1,128], index: 2, kind: input, shape index: {}]   ;;  %s1067_s3 = inlined_call_operand.hbm [shape: f32[4,16,128], index: 3, kind: output, shape index: {}]  }
   0x1   :  { %10 = vsyncpa [#allocation3 + $0x1], 0 }
   0x2   :  { %11 = vsyncpa [#allocation6], 0 }
   0x3   :  { %13 = vsyncpa [#allocation6 + $0x1], 0 }
   0x4   :  { %14 = vsyncpa [#allocation4], 0 }
   0x5   :  { %16 = vsyncpa [#allocation4 + $0x1], 0  ;;  %s808_s12 = smov 0   ;;  %s810_s13 = smov 0  }
   0x6   :  { %s812_s14 = smov 0   ;;  %s814_s15 = smov 0  }
   0x7 LB: > { %s829_s16 = sadd.s32 4294967295, %s777_s15   ;;  %s482_s17 = sadd.s32 4294967294, %s777_s15   ;;  %s777_s15 = sphi %s814_s15, %s1082_s15   ;;  %s773_s14 = sphi %s812_s14, %s1081_s14   ;;  %s769_s13 = sphi %s810_s13, %s1080_s13   ;;  %s765_s12 = sphi %s808_s12, %s1079_s12  }
   0x8   : > { %s833_s18 = sadd.s32 1, %s777_s15   ;;  %s29_s19 = sadd.s32 1, %s773_s14 }
   0x9   : > { %s26_s20 = ssub.s32 %s777_s15, %s833_s18  ;;  %p36_p0 = scmp.ne.s32.totalorder %s773_s14, %s769_s13 }
   0xa   : > { %p27_p1 = scmp.eq.s32.totalorder %s26_s20, 0  ;;  %p37_p2 = scmp.eq.s32.totalorder %s777_s15, 0 }
   0xb   : > { %p42_p3 = scmp.ne.s32.totalorder %s769_s13, %s765_s12  ;;  %p43_p4 = scmp.eq.s32.totalorder %s829_s16, 0 }
   0xc   : > { %s845_s21 = scalar_select %p27_p1, %s773_s14, %s29_s19  }
   0xd   : > { %p847_p5 = por %p37_p2, %p36_p0  ;;  %p851_p6 = por %p43_p4, %p42_p3 }
   0xe   : > { %p118_p7 = scmp.eq.s32.totalorder %s829_s16, 3  ;;  %p124_p8 = scmp.eq.s32.totalorder %s482_s17, 3 }
   0xf   : > { %s1071_s23 = scalar_select %p851_p6, 1, 0 }
  0x10   : > { %p607_p9 = scmp.lt.s32.totalorder %s777_s15, 4  ;;  %p857_p10 = por %p118_p7, %p36_p0 }
  0x11   : > { %p861_p11 = por %p124_p8, %p42_p3  ;;  %s866_s26 = sand.u32 1, %s773_s14  }
  0x12   : > { %s1072_s24 = scalar_select %p857_p10, 1, 0 }
  0x13   : > { %s1073_s25 = scalar_select %p861_p11, 1, 0 }
  0x14   : > { %s501_s27 = sshll.u32 %s777_s15, 9  ;;  %s485_s28 = sshll.u32 %s866_s26, 5 }
  0x15   : > { %s873_s4 = scalar_lea.hbm %s1064_s0, %s501_s27  ;;  %s148_s5 = scalar_lea.vmem [#allocation2], %s485_s28 }
  0x16   : > { %s155_s6 = sshll.u32 %s148_s5, 4  ;;  %p877_p12 = pnand %p607_p9, %p847_p5  ;;  %s881_s6 = int_to_ptr.vmem [resolvable:$true] %s155_s6 }
  0x17   : > { %s145_s8 = scalar_lea.sflag [#allocation3], %s866_s26  ;;  %s647_s9 = scalar_lea.hbm %s873_s4, 512 }
  0x18   : > { %p648_p13 = scmp.ne.s32.totalorder %s873_s4, %s647_s9  ;;  %p649_p0 = pneg %p877_p12 }
  0x19   : > { %s652_s17 = scalar_lea.hbm %s1064_s0, 2048  ;;  %p653_p3 = scmp.lt.u32.totalorder %s873_s4, %s1064_s0 }
  0x1a   : > { %p650_p1 = pnand %p649_p0, %p648_p13  ;;  %p654_p4 = scmp.lt.u32.totalorder %s652_s17, %s647_s9 }
  0x1b   : > { %p656_p7 = scmp.lt.u32.totalorder %s647_s9, %s873_s4 }
  0x1c   : > { %p651_p2 = pneg %p650_p1  ;;  %p655_p5 = por %p654_p4, %p653_p3 }
  0x1e   : > { %p657_p8 = por %p656_p7, %p655_p5 }
  0x20   : > { %p658_p9 = pnand %p657_p8, %p651_p2 }
  0x22   : > { %661 = shalt.err (!%p658_p9)
}
  0x23   : > { %s662_s22 = scalar_lea.vmem %s881_s6, 512  ;;  %s779_s27 = smov [#allocation2]  }
  0x24   : > { %p663_p13 = scmp.ne.s32.totalorder %s881_s6, %s662_s22  ;;  %s667_s28 = sshll.u32 %s779_s27, 4  ;;  %s668_s28 = int_to_ptr.vmem [resolvable:$false] %s667_s28 }
  0x25   : > { %s669_s29 = scalar_lea.vmem %s668_s28, 1024  ;;  %p670_p10 = scmp.lt.s32.totalorder %s881_s6, %s668_s28 }
  0x26   : > { %p665_p1 = pnand %p663_p13, %p649_p0  ;;  %p671_p3 = scmp.lt.s32.totalorder %s669_s29, %s662_s22 }
  0x28   : > { %p666_p11 = pneg %p665_p1  ;;  %p672_p4 = por %p671_p3, %p670_p10 }
  0x2a   : > { %p673_p5 = pnand %p672_p4, %p666_p11 }
  0x2c   : > { %676 = shalt.err (!%p673_p5)
}
  0x2d   : > { %s780_s30 = smov 256   ;;  %s781_s5 = smov 16  }
  0x2e   : > { %599 = dma.hbm_to_vmem [thread:$0]  (!%p877_p12), %s873_s4, 512, %s881_s6, %s145_s8, %s780_s30, %s780_s30, %s781_s5  }
  0x2f   : > { %p491_p2 = scmp.ge.s32.totalorder %s777_s15, 1  ;;  %p190_p7 = scmp.lt.s32.totalorder %s777_s15, 5 }
  0x30   : > { %s488_s9 = sshll.u32 %s866_s26, 8  ;;  %s502_s11 = sshll.u32 %s777_s15, 12 }
  0x31   : > { %p914_p10 = pnand %p491_p2, %p190_p7  ;;  %s169_s17 = scalar_lea.vmem [#allocation5], %s488_s9 }
  0x32   : > { %s176_s19 = sshll.u32 %s169_s17, 4  ;;  %s922_s27 = scalar_lea.hbm %s1065_s1, %s502_s11  ;;  %s924_s19 = int_to_ptr.vmem [resolvable:$true] %s176_s19 }
  0x33   : > { %s166_s4 = scalar_lea.sflag [#allocation6], %s866_s26  ;;  %s677_s6 = scalar_lea.hbm %s922_s27, 4096 }
  0x34   : > { %p678_p11 = scmp.ne.s32.totalorder %s922_s27, %s677_s6  ;;  %s682_s29 = scalar_lea.hbm %s1065_s1, 16384 }
  0x35   : > { %p683_p13 = scmp.lt.u32.totalorder %s922_s27, %s1065_s1  ;;  %p684_p1 = scmp.lt.u32.totalorder %s682_s29, %s677_s6 }
  0x36   : > { %p680_p8 = pnand %p678_p11, %p649_p0  ;;  %p686_p4 = scmp.lt.u32.totalorder %s677_s6, %s922_s27 }
  0x37   : > { %p685_p3 = por %p684_p1, %p683_p13 }
  0x38   : > { %p681_p9 = pneg %p680_p8 }
  0x39   : > { %p687_p5 = por %p686_p4, %p685_p3 }
  0x3b   : > { %p688_p2 = pnand %p687_p5, %p681_p9 }
  0x3d   : > { %691 = shalt.err (!%p688_p2)
}
  0x3e   : > { %s692_s9 = scalar_lea.vmem %s924_s19, 4096  ;;  %s782_s11 = smov [#allocation5]  }
  0x3f   : > { %p693_p7 = scmp.ne.s32.totalorder %s924_s19, %s692_s9  ;;  %s697_s17 = sshll.u32 %s782_s11, 4  ;;  %s698_s17 = int_to_ptr.vmem [resolvable:$false] %s697_s17 }
  0x40   : > { %s699_s20 = scalar_lea.vmem %s698_s17, 8192  ;;  %p700_p6 = scmp.lt.s32.totalorder %s924_s19, %s698_s17 }
  0x41   : > { %p695_p11 = pnand %p693_p7, %p649_p0  ;;  %p701_p13 = scmp.lt.s32.totalorder %s699_s20, %s692_s9 }
  0x43   : > { %p696_p8 = pneg %p695_p11  ;;  %p702_p1 = por %p701_p13, %p700_p6 }
  0x45   : > { %p703_p3 = pnand %p702_p1, %p696_p8 }
  0x47   : > { %706 = shalt.err (!%p703_p3)
}
  0x48   : > { %s783_s22 = smov 128   ;;  %s784_s6 = smov 8  }
  0x49   : > { %602 = dma.hbm_to_vmem [thread:$0]  (!%p877_p12), %s922_s27, 4096, %s924_s19, %s166_s4, %s783_s22, %s783_s22, %s784_s6  }
  0x4a   : > { %194 = sbr.rel (%p914_p10) target bundleno = 352 (0x160), region = 32  ;;  %s955_s8 = sand.u32 (!%p914_p10), 1, %s769_s13  }
  0x4b   : > { %s492_s28 = sshll.u32 (!%p914_p10), %s955_s8, 5  ;;  %s197_s29 = scalar_lea.sflag (!%p914_p10), [#allocation3], %s955_s8 }
  0x4c   : > { %s959_s30 = scalar_lea.vmem (!%p914_p10), [#allocation2], %s492_s28  ;;  %p1076_p6 = scmp.ne.s32.totalorder (!%p914_p10), %s1071_s23, 0 }
  0x51   : > { %752 = dma.done.wait (%p1076_p6), %s197_s29, 512  }
  0x52   : > { %754 = vsyncadd (%p1076_p6), %s197_s29, 4294966784  ;;  %s493_s26 = sshll.u32 %s955_s8, 8  ;;  %s206_s7 = scalar_lea.sflag [#allocation6], %s955_s8 }
  0x53   : > { %s967_s10 = scalar_lea.vmem [#allocation5], %s493_s26 }
  0x54   : > { %756 = dma.done.wait (%p1076_p6), %s206_s7, 4096  }
  0x55   : > { %758 = vsyncadd (%p1076_p6), %s206_s7, 4294963200  ;;  %v263_v0 = vld [vmem:[%s967_s10 + $0x80] sm:$0xff]  ;;  %v264_v1 = vld [vmem:[%s967_s10 + $0x88] sm:$0xff]  ;;  %p240_p12 = scmp.lt.s32.totalorder %s829_s16, 3  ;;  %s494_s23 = sshll.u32 %s955_s8, 4 }
  0x56   : > { %v247_v2 = vld [vmem:[%s967_s10] sm:$0xff]  ;;  %v542_v3 = vpack.c.bf16 %v264_v1, %v263_v0  ;;  %v248_v4 = vld [vmem:[%s967_s10 + $0x8] sm:$0xff]  ;;  %v265_v5 = vld [vmem:[%s967_s10 + $0x90] sm:$0xff]  ;;  %s239_s9 = scalar_lea.vmem [#allocation7], %s494_s23  ;;  %s503_s17 = sshll.u32 %s829_s16, 8 }
  0x57   : > { %v266_v6 = vld [vmem:[%s967_s10 + $0x98] sm:$0xff]  ;;  %v544_v7 = vpack.c.bf16 %v248_v4, %v247_v2  ;;  %v249_v9 = vld [vmem:[%s967_s10 + $0x10] sm:$0xff]  ;;  %v267_v11 = vld [vmem:[%s967_s10 + $0xa0] sm:$0xff]  ;;  %s241_s19 = scalar_select %p240_p12, %s829_s16, 3 }
  0x58   : > { %v546_v8 = vpack.c.bf16 %v266_v6, %v265_v5  ;;  %v250_v10 = vld [vmem:[%s967_s10 + $0x18] sm:$0xff]  ;;  %543 = vmatprep.subr.bf16.mxu0 %v542_v3  ;;  %574 = vmatprep.subr.bf16.mxu1 %v542_v3  ;;  %v268_v12 = vld [vmem:[%s967_s10 + $0xa8] sm:$0xff]  ;;  %v251_v15 = vld [vmem:[%s967_s10 + $0x20] sm:$0xff]  ;;  %s377_s11 = sshll.u32 %s239_s9, 4  ;;  %s1021_s6 = scalar_lea.hbm %s1067_s3, %s503_s17  ;;  %s1016_s11 = int_to_ptr.vmem [resolvable:$true] %s377_s11 }
  0x59   : > { %545 = vmatpush3.bf16.msra.mxu0 %v544_v7  ;;  %582 = vmatpush3.bf16.msra.mxu1 %v544_v7  ;;  %v548_v13 = vpack.c.bf16 %v250_v10, %v249_v9  ;;  %v550_v14 = vpack.c.bf16 %v268_v12, %v267_v11  ;;  %v252_v16 = vld [vmem:[%s967_s10 + $0x28] sm:$0xff]  ;;  %v269_v17 = vld [vmem:[%s967_s10 + $0xb0] sm:$0xff]  ;;  %v270_v18 = vld [vmem:[%s967_s10 + $0xb8] sm:$0xff]  ;;  %s242_s5 = scalar_lea.vmem %s1066_s2, %s241_s19  ;;  %s364_s16 = scalar_lea.sflag [#allocation4], %s955_s8 }
  0x5a   : > { %547 = vmatprep.subr.bf16.mxu0 %v546_v8  ;;  %575 = vmatprep.subr.bf16.mxu1 %v546_v8  ;;  %v552_v19 = vpack.c.bf16 %v252_v16, %v251_v15  ;;  %v554_v20 = vpack.c.bf16 %v270_v18, %v269_v17  ;;  %v253_v21 = vld [vmem:[%s967_s10 + $0x30] sm:$0xff]  ;;  %v254_v22 = vld [vmem:[%s967_s10 + $0x38] sm:$0xff]  ;;  %v271_v23 = vld [vmem:[%s967_s10 + $0xc0] sm:$0xff]  ;;  %s707_s28 = scalar_lea.vmem %s1016_s11, 256  ;;  %p1077_p10 = scmp.ne.s32.totalorder %s1072_s24, 0 }
  0x5b   : > { %v272_v24 = vld [vmem:[%s967_s10 + $0xc8] sm:$0xff]  ;;  %v246_v26 = vld [vmem:[%s959_s30 + $0x18] sm:$0xff]  ;;  %v556_v27 = vpack.c.bf16 %v254_v22, %v253_v21  ;;  %v255_v29 = vld [vmem:[%s967_s10 + $0x40] sm:$0xff]  ;;  %p708_p0 = scmp.ne.s32.totalorder %s1016_s11, %s707_s28  ;;  %s785_s29 = smov [#allocation7]  }
  0x5c   : > { %v244_v25 = vld [vmem:[%s959_s30 + $0x8] sm:$0xff]  ;;  %v558_v28 = vpack.c.bf16 %v272_v24, %v271_v23  ;;  %v273_v31 = vld [vmem:[%s967_s10 + $0xd0] sm:$0xff]  ;;  %v274_v32 = vld [vmem:[%s967_s10 + $0xd8] sm:$0xff]  ;;  %355 = vmatprep.mubr.f32.mxu1 %v246_v26 }
  0x5d   : > { %549 = vmatpush3.bf16.msra.mxu0 %v548_v13  ;;  %583 = vmatpush3.bf16.msra.mxu1 %v548_v13  ;;  %v256_v30 = vld [vmem:[%s967_s10 + $0x48] sm:$0xff]  ;;  %v562_v34 = vpack.c.bf16 %v274_v32, %v273_v31  ;;  %v257_v35 = vld [vmem:[%s967_s10 + $0x50] sm:$0xff]  ;;  %v258_v36 = vld [vmem:[%s967_s10 + $0x58] sm:$0xff]  ;;  %p709_p9 = pnand %p708_p0, %p1077_p10 }
  0x5e   : > { %551 = vmatprep.subr.bf16.mxu0 %v550_v14  ;;  %576 = vmatprep.subr.bf16.mxu1 %v550_v14  ;;  %v560_v33 = vpack.c.bf16 %v256_v30, %v255_v29  ;;  %v275_v37 = vld [vmem:[%s967_s10 + $0xe0] sm:$0xff]  ;;  %v276_v38 = vld [vmem:[%s967_s10 + $0xe8] sm:$0xff]  ;;  %v564_v39 = vpack.c.bf16 %v258_v36, %v257_v35  ;;  %v277_v43 = vld [vmem:[%s967_s10 + $0xf0] sm:$0xff] }
  0x5f   : > { %350 = vmatprep.mubr.f32.mxu0 %v244_v25  ;;  %v566_v40 = vpack.c.bf16 %v276_v38, %v275_v37  ;;  %v259_v41 = vld [vmem:[%s967_s10 + $0x60] sm:$0xff]  ;;  %v260_v42 = vld [vmem:[%s967_s10 + $0x68] sm:$0xff]  ;;  %v278_v44 = vld [vmem:[%s967_s10 + $0xf8] sm:$0xff]  ;;  %p710_p4 = pneg %p709_p9 }
  0x60   : > { %v568_v45 = vpack.c.bf16 %v260_v42, %v259_v41  ;;  %v570_v46 = vpack.c.bf16 %v278_v44, %v277_v43  ;;  %v261_v47 = vld [vmem:[%s967_s10 + $0x70] sm:$0xff]  ;;  %v262_v48 = vld [vmem:[%s967_s10 + $0x78] sm:$0xff]  ;;  %v243_v50 = vld [vmem:[%s959_s30] sm:$0xff] }
  0x61   : > { %553 = vmatpush3.bf16.msra.mxu0 %v552_v19  ;;  %584 = vmatpush3.bf16.msra.mxu1 %v552_v19  ;;  %v572_v49 = vpack.c.bf16 %v262_v48, %v261_v47  ;;  %v245_v51 = vld [vmem:[%s959_s30 + $0x10] sm:$0xff]  ;;  %v495_v54 = vld [vmem:[%s242_s5] ss:$0 sm:$0xff]  ;;  %s711_s30 = sshll.u32 %s785_s29, 4  ;;  %s712_s30 = int_to_ptr.vmem [resolvable:$false] %s711_s30 }
  0x62   : > { %555 = vmatprep.subr.bf16.mxu0 %v554_v20  ;;  %577 = vmatprep.subr.bf16.mxu1 %v554_v20  ;;  %s713_s26 = scalar_lea.vmem %s712_s30, 512  ;;  %p714_p5 = scmp.lt.s32.totalorder %s1016_s11, %s712_s30 }
  0x63   : > { %p715_p2 = scmp.lt.s32.totalorder %s713_s26, %s707_s28 }
  0x65   : > { %557 = vmatpush3.bf16.msra.mxu0 %v556_v27  ;;  %585 = vmatpush3.bf16.msra.mxu1 %v556_v27  ;;  %p716_p7 = por %p715_p2, %p714_p5 }
  0x66   : > { %559 = vmatprep.subr.bf16.mxu0 %v558_v28  ;;  %578 = vmatprep.subr.bf16.mxu1 %v558_v28 }
  0x67   : > { %p717_p11 = pnand %p716_p7, %p710_p4 }
  0x69   : > { %561 = vmatpush3.bf16.msra.mxu0 %v560_v33  ;;  %586 = vmatpush3.bf16.msra.mxu1 %v560_v33 }
  0x6a   : > { %563 = vmatprep.subr.bf16.mxu0 %v562_v34  ;;  %579 = vmatprep.subr.bf16.mxu1 %v562_v34 }
  0x6d   : > { %565 = vmatpush3.bf16.msra.mxu0 %v564_v39  ;;  %587 = vmatpush3.bf16.msra.mxu1 %v564_v39 }
  0x6e   : > { %567 = vmatprep.subr.bf16.mxu0 %v566_v40  ;;  %580 = vmatprep.subr.bf16.mxu1 %v566_v40 }
  0x71   : > { %569 = vmatpush3.bf16.msra.mxu0 %v568_v45  ;;  %588 = vmatpush3.bf16.msra.mxu1 %v568_v45 }
  0x72   : > { %571 = vmatprep.subr.bf16.mxu0 %v570_v46  ;;  %581 = vmatprep.subr.bf16.mxu1 %v570_v46 }
  0x75   : > { %573 = vmatpush3.bf16.msra.mxu0 %v572_v49  ;;  %589 = vmatpush3.bf16.msra.mxu1 %v572_v49 }
  0x78   : > { %351 = vmatmul.mubr.f32.vlgmr.msra.gmra.mrb[0].mxu0 %v243_v50  ;;  %356 = vmatmul.mubr.f32.vlgmr.msra.gmra.mrb[0].mxu1 %v245_v51 }
 0x14b   : > { %v536_v52 = vpop.f32.mrb[0].mxu0  ;;  %v539_v53 = vpop.f32.mrb[0].mxu1 }
 0x14c   : > { %v537_v55 = vpop.f32.mrb[1].mxu0  ;;  %v540_v56 = vpop.f32.mrb[1].mxu1 }
 0x14d   : > { %v538_v57 = vadd.f32 %v537_v55, %v536_v52  ;;  %v541_v58 = vadd.f32 %v540_v56, %v539_v53 }
 0x14f   : > { %v353_v59 = vadd.f32 %v538_v57, %v495_v54  ;;  %v358_v60 = vadd.f32 %v541_v58, %v495_v54 }
 0x151   : > { %361 = vst [vmem:[%s239_s9] sm:$0xff] %v353_v59  ;;  %362 = vst [vmem:[%s239_s9 + $0x8] sm:$0xff] %v358_v60 }
 0x152   : > { %720 = shalt.err (!%p717_p11)
}
 0x153   : > { %s721_s7 = scalar_lea.hbm %s1021_s6, 256  ;;  %s725_s19 = scalar_lea.hbm %s1067_s3, 1024 }
 0x154   : > { %p722_p8 = scmp.ne.s32.totalorder %s1021_s6, %s721_s7  ;;  %p726_p3 = scmp.lt.u32.totalorder %s1021_s6, %s1067_s3 }
 0x155   : > { %p727_p6 = scmp.lt.u32.totalorder %s725_s19, %s721_s7  ;;  %p729_p0 = scmp.lt.u32.totalorder %s721_s7, %s1021_s6 }
 0x156   : > { %p723_p13 = pnand %p722_p8, %p1077_p10 }
 0x157   : > { %p728_p12 = por %p727_p6, %p726_p3 }
 0x158   : > { %p724_p1 = pneg %p723_p13 }
 0x159   : > { %p730_p9 = por %p729_p0, %p728_p12 }
 0x15b   : > { %p731_p4 = pnand %p730_p9, %p724_p1 }
 0x15d   : > { %734 = shalt.err (!%p731_p4)
}
 0x15e   : > { %s786_s5 = smov 128   ;;  %s787_s9 = smov 8  }
 0x15f   : > { %594 = dma.vmem_to_hbm [thread:$0]  (%p1077_p10), %s1016_s11, 256, %s1021_s6, %s364_s16, %s786_s5, %s786_s5, %s787_s9  }
 0x160 PF: > { %p608_p5 = scmp.ge.s32.totalorder %s777_s15, 2  ;;  %s392_s17 = sand.u32 1, %s765_s12  }
 0x161   : > { %p1078_p2 = scmp.ne.s32.totalorder %s1073_s25, 0  ;;  %s393_s20 = scalar_lea.sflag [#allocation4], %s392_s17 }
 0x163   : > { %p604_p7 = pnand %p608_p5, %p1078_p2 }
 0x165   : > { %760 = dma.done.wait (!%p604_p7), %s393_s20, 256  }
 0x166   : > { %762 = vsyncadd (!%p604_p7), %s393_s20, 4294967040  ;;  %p19_p11 = scmp.ge.s32.totalorder %s833_s18, 6   ;;  %s1079_s12 = smov %s769_s13 }
 0x167   : > { %s1080_s13 = smov %s773_s14  ;;  %s1081_s14 = smov %s845_s21 }
 0x168   : > { %s1082_s15 = smov %s833_s18  ;;  %21 = sbr.rel (!%p19_p11) target bundleno = 7 (0x7), region = 93 }
 0x16f   :  { %398 = vsyncpa [#allocation3], 1 }
 0x170   :  { %400 = vsyncpa [#allocation3 + $0x1], 1 }
 0x171   :  { %401 = vsyncpa [#allocation6], 1 }
 0x172   :  { %403 = vsyncpa [#allocation6 + $0x1], 1 }
 0x173   :  { %404 = vsyncpa [#allocation4], 1 }
 0x174   :  { %406 = vsyncpa [#allocation4 + $0x1], 1 }

</bundles_post_ra>
